<compile_context>
chip_gen: v7x
topology: tpu7x:2x2x1
jax: 0.10.0
libtpu: 0.0.40
codegen_flags: <defaults>
</compile_context>

<pallas_src>
import jax
import jax.numpy as jnp
from jax.experimental import pallas as pl
from jax.experimental.pallas import tpu as pltpu


# layout: caption_lengths -> (B, 1) int32 in VMEM.
#         left endpoints  -> one (B, N_pad) int32 plane. Entry i of row b is the
#                            left endpoint of the i-th span of the
#                            right-branching tree of length L_b, i.e. L_b-2-i,
#                            padded with -1 past the (L_b - 1) internal nodes.
#                            The right endpoint is always L_b-1 (host-derived).
def _right_branching_kernel(len_ref, left_ref):
    B, N = left_ref.shape
    lengths = len_ref[...]                                       # (B, 1) int32
    span_idx = jax.lax.broadcasted_iota(jnp.int32, (B, N), 1)    # 0..N-1 (lanes)
    # i-th reduction of a right-branching tree over tokens 0..L-1 merges the
    # span (L-2-i, L-1), for i = 0 .. L-2  (matches
    # get_spans(get_right_branching_tree(L)) shift-reduce order).
    left = lengths - 2 - span_idx                                # (B, N)
    valid = span_idx < (lengths - 1)                             # (B, N) bool
    left_ref[...] = jnp.where(valid, left, -1)                   # lane-dense vst


def right_branching_forward(captions, caption_lengths, *videos):
    """JAX/Pallas equivalent of RightBranching.forward.

    Returns (spans, fake_loss, fake_loss, fake_loss, fake_loss) where `spans`
    is a Python list (one entry per batch element) of (left, right) tuples.
    """
    del videos  # unused by the reference module as well
    B = int(caption_lengths.shape[0])
    T = int(captions.shape[1])
    n_spans = max(T - 1, 1)
    # Lane-pad the output so stores are full-width `vst` (not masked partials);
    # the padding is trimmed host-side.
    n_pad = ((n_spans + 127) // 128) * 128

    lens = caption_lengths.astype(jnp.int32).reshape(B, 1)
    # NOTE: single full-array block; a batch grid with
    # dimension_semantics=("parallel",) only pays off for very large B (v7x 2-TC).
    left = pl.pallas_call(
        _right_branching_kernel,
        out_shape=jax.ShapeDtypeStruct((B, n_pad), jnp.int32),
        in_specs=[pl.BlockSpec(memory_space=pltpu.MemorySpace.VMEM)],
        out_specs=pl.BlockSpec(memory_space=pltpu.MemorySpace.VMEM),
    )(lens)

    # Host-side glue: one batched blocking transfer, then build the Python
    # span lists the PyTorch module returns.
    # TODO(synk): the nested shift-reduce tree object from
    # get_right_branching_tree has no tensor equivalent; only its span list
    # (which is all downstream code consumes) is reproduced.
    left_h, lens_h = jax.device_get((left, caption_lengths))
    spans = []
    for b in range(B):
        L = int(lens_h[b])
        n_valid = max(min(L - 1, n_pad), 0)   # clamp in case L > T (input error)
        r = L - 1
        spans.append([(int(l), r) for l in left_h[b, :n_valid]])
    fake_loss = jnp.zeros((), jnp.float32)
    return spans, fake_loss, fake_loss, fake_loss, fake_loss


def _ref_right_branching_spans(length):
    # Pure-Python reference for get_spans(get_right_branching_tree(length)):
    # inclusive-index spans of all internal nodes, in shift-reduce order
    # (smallest span merged first): (L-2,L-1), (L-3,L-1), ..., (0,L-1).
    return [(l, length - 1) for l in range(length - 2, -1, -1)]


if __name__ == "__main__":
    key = jax.random.PRNGKey(0)
    B, T, V = 2, 8, 100
    captions = jax.random.randint(key, (B, T), 0, V, dtype=jnp.int32)
    caption_lengths = jnp.array([8, 5], dtype=jnp.int32)
    # dummy video features (ignored by the module, passed via *videos)
    videos = jax.random.normal(
        jax.random.fold_in(key, 1), (B, 4, 32), dtype=jnp.float32)

    spans, l1, l2, l3, l4 = right_branching_forward(
        captions, caption_lengths, videos)
    jax.block_until_ready(l1)

    expected = [_ref_right_branching_spans(int(l)) for l in caption_lengths.tolist()]
    assert spans == expected, (spans, expected)
    assert float(l1) == 0.0 and float(l4) == 0.0

    print("KERNEL_OK")
</pallas_src>

<mosaic_0001>
module attributes {stable_mosaic.version = 11 : i64} {
  func.func @_right_branching_kernel(%arg0: memref<2x1xi32, #tpu.memory_space<vmem>>, %arg1: memref<2x128xi32, #tpu.memory_space<vmem>>) attributes {dimension_semantics = [], scalar_prefetch = 0 : i64, scratch_operands = 0 : i64, tpu.core_type = #tpu.core_type<tc>} {
    %c0 = arith.constant 0 : index
    %c0_0 = arith.constant 0 : index
    %0 = vector.load %arg0[%c0, %c0_0] : memref<2x1xi32, #tpu.memory_space<vmem>>, vector<2x1xi32>
    %1 = tpu.iota {dimensions = array<i32: 1>} : vector<2x128xi32>
    %c2_i32 = arith.constant 2 : i32
    %2 = vector.broadcast %c2_i32 : i32 to vector<2x1xi32>
    %3 = arith.subi %0, %2 : vector<2x1xi32>
    %4 = vector.broadcast %3 : vector<2x1xi32> to vector<2x128xi32>
    %5 = arith.subi %4, %1 : vector<2x128xi32>
    %c1_i32 = arith.constant 1 : i32
    %6 = vector.broadcast %c1_i32 : i32 to vector<2x1xi32>
    %7 = arith.subi %0, %6 : vector<2x1xi32>
    %8 = vector.broadcast %7 : vector<2x1xi32> to vector<2x128xi32>
    %9 = arith.cmpi slt, %1, %8 : vector<2x128xi32>
    %c-1_i32 = arith.constant -1 : i32
    %10 = vector.broadcast %c-1_i32 : i32 to vector<2x128xi32>
    %11 = arith.select %9, %5, %10 : vector<2x128xi1>, vector<2x128xi32>
    %c0_1 = arith.constant 0 : index
    %c0_2 = arith.constant 0 : index
    %12 = vector.load %arg1[%c0_1, %c0_2] : memref<2x128xi32, #tpu.memory_space<vmem>>, vector<2x128xi32>
    tpu.vector_store %arg1[%c0_1, %c0_2], %11 {strides = array<i32>} : memref<2x128xi32, #tpu.memory_space<vmem>>, vector<2x128xi32>,
    return
  }
}

</mosaic_0001>

<bundles_post_ra>
// kernel: tpu_custom_call.1
= control target key start
LH: loop header
LB: loop body
LE: loop exit
PB: predicated region body
PF: predicated region fallthrough
CT: control target
= control target key end

     0   :  { %s94_s0 = inlined_call_operand.vmem [shape: s32[2,1], index: 0, kind: input, shape index: {}]   ;;  %s95_s1 = inlined_call_operand.hbm [shape: s32[2,128], index: 1, kind: output, shape index: {}]  }
   0x1   :  { %v9_v0 = vld [vmem:[%s94_s0] sm:$0x3] }
   0x2   :  { %6 = vsyncpa [#allocation3], 0  ;;  %v67_v1 = vmov 0   ;;  %v38_v2 = vadd.s32 4294967294, %v9_v0  ;;  %v39_v3 = vadd.s32 4294967295, %v9_v0  ;;  %v10_v4 = vlaneseq  ;;  %s68_s8 = smov [#allocation2]  }
   0x3   :  { %42 = vset.pattern.permute.xlu0 %v67_v1  ;;  %s30_s9 = sshll.u32 %s68_s8, 4  ;;  %s31_s9 = int_to_ptr.vmem [resolvable:$true] %s30_s9 }
   0x4   :  { %14 = vperm.xlu0 %42, %v38_v2   ;;  %v11_v5 = vand.u32 127, %v10_v4  ;;  %s43_s10 = scalar_lea.vmem %s31_s9, 32  ;;  %p48_p1 = scmp.lt.s32.totalorder %s31_s9, %s31_s9 }
   0x5   :  { %p44_p0 = scmp.ne.s32.totalorder %s31_s9, %s43_s10  ;;  %p49_p2 = scmp.lt.s32.totalorder %s43_s10, %s43_s10 }
   0x7   :  { %p50_p3 = por %p49_p2, %p48_p1 }
   0x8   :  { %19 = vperm.xlu0 %42, %v39_v3  }
   0x9   :  { %p51_p4 = pnand %p50_p3, %p44_p0 }
  0x83   :  { %v15_v6 = vpop.permute.xlu0 %14 }
  0x84   :  { %v16_v7 = vsub.s32 %v15_v6, %v11_v5 }
  0x87   :  { %v20_v8 = vpop.permute.xlu0 %19 }
  0x88   :  { %vm21_vm0 = vcmp.lt.s32.totalorder %v11_v5, %v20_v8 }
  0x89   :  { %v22_v9 = vsel %vm21_vm0, %v16_v7, 4294967295 }
  0x8a   :  { %23 = vst [vmem:[#allocation2] sm:$0x3] %v22_v9 }
  0x8b   :  { %54 = shalt.err (!%p51_p4)
}
  0x8c   :  { %s55_s12 = scalar_lea.hbm %s95_s1, 32 }
  0x8d   :  { %p56_p5 = scmp.ne.s32.totalorder %s95_s1, %s55_s12  ;;  %p59_p6 = scmp.lt.u32.totalorder %s55_s12, %s95_s1 }
  0x8f   :  { %p61_p7 = pnand %p59_p6, %p56_p5 }
  0x91   :  { %64 = shalt.err (!%p61_p7)
}
  0x92   :  { %33 = dma.vmem_to_hbm [thread:$0]  %s31_s9, 32, %s95_s1, [#allocation3]  }
  0x93   :  { %65 = dma.done.wait [#allocation3], 32  }
  0x94   :  { %66 = vsyncadd [#allocation3], 4294967264 }
  0x95   :  { %37 = vsyncpa [#allocation3], 1 }

</bundles_post_ra>
